<compile_context>
chip_gen: v6e
topology: v6e:2x2x1
jax: 0.10.0
libtpu: 0.0.40
codegen_flags: <defaults>
</compile_context>

<pallas_src>
import functools

import jax
import jax.numpy as jnp
from jax.experimental import pallas as pl
from jax.experimental.pallas import tpu as pltpu


# ------------------------------ Pallas kernels ------------------------------

def _pointer_gen_kernel(x_ref, wproj_ref, bproj_ref, wpg_ref, bpg_ref,
                        attn_ref, idx_ref, out_ref,
                        m_sc, l_sc, alpha_sc, mix_sc, *, inv_temp):
    """Two-pass pointer-generator over vocab tiles.

    Grid = (batch, seq-tile, phase, vocab-tile).
    phase 0: accumulate running max / sum-exp of the projected logits.
    phase 1: emit log( softmax * alpha + scatter(copy-dist) ) per vocab tile.
    """
    phase = pl.program_id(2)
    vt = pl.program_id(3)

    x = x_ref[...]                                          # [tt, D] f32

    @pl.when(jnp.logical_and(phase == 0, vt == 0))
    def _init():
        # p_gen head (VPU row-dot + sigmoid) and the temp-scaled source softmax,
        # computed once per row tile and reused for every vocab tile.
        p = jnp.sum(x * wpg_ref[...], axis=-1, keepdims=True) + bpg_ref[0, 0]
        alpha = 1.0 / (1.0 + jnp.exp(-p))                   # [tt, 1]
        a = attn_ref[...]                                   # [tt, S]
        if inv_temp != 1.0:
            a = a * inv_temp
        a = a - jnp.max(a, axis=-1, keepdims=True)
        ea = jnp.exp(a)
        mix_sc[...] = (1.0 - alpha) * (ea / jnp.sum(ea, axis=-1, keepdims=True))
        alpha_sc[...] = alpha
        m_sc[...] = jnp.full_like(m_sc[...], -jnp.inf)
        l_sc[...] = jnp.zeros_like(l_sc[...])

    # vocab projection for this vocab tile: bf16 MXU operands, f32 accumulation.
    logit = jnp.dot(x.astype(jnp.bfloat16), wproj_ref[...],
                    preferred_element_type=jnp.float32) + bproj_ref[...]   # [tt, tv]
    if inv_temp != 1.0:
        logit = logit * inv_temp

    @pl.when(phase == 0)
    def _accumulate():
        m_new = jnp.maximum(m_sc[...], jnp.max(logit, axis=-1, keepdims=True))
        l_sc[...] = (l_sc[...] * jnp.exp(m_sc[...] - m_new)
                     + jnp.sum(jnp.exp(logit - m_new), axis=-1, keepdims=True))
        m_sc[...] = m_new

    @pl.when(phase == 1)
    def _emit():
        tv = out_ref.shape[-1]
        s = mix_sc.shape[-1]
        # scatter_add along the vocab axis == one-hot matmul restricted to this vocab tile.
        col = jax.lax.broadcasted_iota(jnp.int32, (s, tv), 1) + vt * tv
        onehot = (col == idx_ref[...]).astype(jnp.bfloat16)                 # [S, tv]
        scat = jnp.dot(mix_sc[...].astype(jnp.bfloat16), onehot,
                       preferred_element_type=jnp.float32)                  # [tt, tv]
        # alpha folded into the per-row normalizer: a single [tt,1] scale vector.
        scale = alpha_sc[...] / l_sc[...]
        # NOTE: matches the reference; can be -inf if both terms underflow for a column.
        out_ref[...] = jnp.log(jnp.exp(logit - m_sc[...]) * scale + scat)


def _log_softmax_proj_kernel(x_ref, wproj_ref, bproj_ref, out_ref, m_sc, l_sc):
    """Two-pass log_softmax(x @ W + b) over vocab tiles (pointer_gen=False path)."""
    phase = pl.program_id(2)
    vt = pl.program_id(3)

    logit = jnp.dot(x_ref[...].astype(jnp.bfloat16), wproj_ref[...],
                    preferred_element_type=jnp.float32) + bproj_ref[...]    # [tt, tv]

    @pl.when(jnp.logical_and(phase == 0, vt == 0))
    def _init():
        m_sc[...] = jnp.full_like(m_sc[...], -jnp.inf)
        l_sc[...] = jnp.zeros_like(l_sc[...])

    @pl.when(phase == 0)
    def _accumulate():
        m_new = jnp.maximum(m_sc[...], jnp.max(logit, axis=-1, keepdims=True))
        l_sc[...] = (l_sc[...] * jnp.exp(m_sc[...] - m_new)
                     + jnp.sum(jnp.exp(logit - m_new), axis=-1, keepdims=True))
        m_sc[...] = m_new

    @pl.when(phase == 1)
    def _emit():
        out_ref[...] = logit - m_sc[...] - jnp.log(l_sc[...])


# -------------------------------- wrapper -----------------------------------

def _tiles(T, V, seq_tile, vocab_tile):
    tt = T if seq_tile is None else seq_tile
    # Default vocab tile: full V for small vocabs, 2048 lanes otherwise (v7x 64 MiB friendly).
    tv = (V if V <= 2048 else 2048) if vocab_tile is None else vocab_tile
    assert T % tt == 0
    assert V % tv == 0 and (tv % 128 == 0 or tv == V)
    return tt, tv


def generator_forward(params, x, attn_dist=None, enc_batch_extend_vocab=None,
                      temp=1.0, pointer_gen=True, seq_tile=None, vocab_tile=None):
    """Generator.forward.  x: [B, T, D].  Returns log-distribution [B, T, V] (f32)."""
    B, T, D = x.shape
    V = params['proj_w'].shape[1]
    tt, tv = _tiles(T, V, seq_tile, vocab_tile)
    nv = V // tv
    grid = (B, T // tt, 2, nv)     # (batch, seq tile, softmax pass, vocab tile)

    cp = pltpu.CompilerParams(
        dimension_semantics=("parallel", "parallel", "arbitrary", "arbitrary"),
        vmem_limit_bytes=48 * 1024 * 1024)   # re-derived for the v7x 64 MiB physical VMEM

    wproj = params['proj_w'].astype(jnp.bfloat16)            # bf16 MXU operand, half the DMA
    bproj = params['proj_b'].reshape(1, V).astype(jnp.float32)

    common_specs = [
        pl.BlockSpec((None, tt, D), lambda b, t, p, v: (b, t, 0)),   # x row tile
        pl.BlockSpec((D, tv), lambda b, t, p, v: (0, v)),            # streamed weight tile
        pl.BlockSpec((1, tv), lambda b, t, p, v: (0, v)),            # bias tile
    ]
    # During phase 0 the output index is pinned to vocab-tile 0, so nothing unfinished is
    # ever flushed to HBM; phase 1 writes each tile exactly once (lane-dense, multiple of 128).
    out_spec = pl.BlockSpec((None, tt, tv), lambda b, t, p, v: (b, t, p * v))
    out_shape = jax.ShapeDtypeStruct((B, T, V), jnp.float32)
    stats = [pltpu.VMEM((tt, 1), jnp.float32),      # running max
             pltpu.VMEM((tt, 1), jnp.float32)]      # running sum-exp

    if not pointer_gen:
        return pl.pallas_call(
            _log_softmax_proj_kernel,
            grid=grid,
            in_specs=common_specs,
            out_specs=out_spec,
            out_shape=out_shape,
            scratch_shapes=stats,
            compiler_params=cp,
        )(x, wproj, bproj)

    S = attn_dist.shape[-1]
    # TODO(synk): extended-vocab OOV ids (>= V, the extra_zeros path) and the beam_search
    #             re-broadcast of enc_batch_extend_vocab[0] are not implemented; indices are
    #             assumed to lie in [0, V).
    idx = enc_batch_extend_vocab.astype(jnp.int32).reshape(B, S, 1)

    return pl.pallas_call(
        functools.partial(_pointer_gen_kernel, inv_temp=1.0 / float(temp)),
        grid=grid,
        in_specs=common_specs + [
            pl.BlockSpec((1, D), lambda b, t, p, v: (0, 0)),              # p_gen weight
            pl.BlockSpec(memory_space=pltpu.MemorySpace.SMEM),            # p_gen bias (scalar)
            pl.BlockSpec((None, tt, S), lambda b, t, p, v: (b, t, 0)),    # attn_dist tile
            pl.BlockSpec((None, S, 1), lambda b, t, p, v: (b, 0, 0)),     # enc indices per batch
        ],
        out_specs=out_spec,
        out_shape=out_shape,
        scratch_shapes=stats + [
            pltpu.VMEM((tt, 1), jnp.float32),      # alpha
            pltpu.VMEM((tt, S), jnp.float32),      # (1 - alpha) * softmax(attn / temp)
        ],
        compiler_params=cp,
    )(x, wproj, bproj, params['pgen_w'], params['pgen_b'].reshape(1, 1).astype(jnp.float32),
      attn_dist, idx)


# ---------------------------- pure-JAX reference ----------------------------

def generator_reference(params, x, attn_dist=None, enc_idx=None,
                        temp=1.0, pointer_gen=True):
    logit = jnp.einsum('btd,dv->btv', x, params['proj_w']) + params['proj_b']
    if not pointer_gen:
        return jax.nn.log_softmax(logit, axis=-1)
    p_gen = jnp.einsum('btd,od->bto', x, params['pgen_w']) + params['pgen_b']
    alpha = jax.nn.sigmoid(p_gen)
    vocab_dist = alpha * jax.nn.softmax(logit / temp, axis=-1)
    attn_sm = (1.0 - alpha) * jax.nn.softmax(attn_dist / temp, axis=-1)
    V = logit.shape[-1]
    onehot = jax.nn.one_hot(enc_idx, V, dtype=jnp.float32)            # [B, S, V]
    scat = jnp.einsum('bts,bsv->btv', attn_sm, onehot)
    return jnp.log(vocab_dist + scat)


# ---------------------------------- demo -------------------------------------

if __name__ == "__main__":
    B, T, D, V, S = 2, 8, 32, 512, 16

    key = jax.random.PRNGKey(0)
    k1, k2, k3, k4, k5, k6, k7 = jax.random.split(key, 7)
    params = {
        'proj_w': 0.05 * jax.random.normal(k1, (D, V), jnp.float32),   # Linear(d_model, vocab), [in, out]
        'proj_b': 0.05 * jax.random.normal(k2, (V,), jnp.float32),
        'pgen_w': 0.05 * jax.random.normal(k3, (1, D), jnp.float32),   # Linear(hidden_dim, 1)
        'pgen_b': 0.05 * jax.random.normal(k4, (1,), jnp.float32),
    }
    x = jax.random.normal(k5, (B, T, D), jnp.float32)
    attn_dist = jax.random.normal(k6, (B, T, S), jnp.float32)
    enc_batch_extend_vocab = jax.random.randint(k7, (B, S), 0, V, dtype=jnp.int32)

    # vocab_tile=256 exercises the tiled two-pass softmax (nv=2); the temp=2.0 call covers
    # the single-vocab-tile path (nv=1) plus the temperature scaling.
    out_ptr = generator_forward(params, x, attn_dist, enc_batch_extend_vocab,
                                temp=1.0, pointer_gen=True, vocab_tile=256)
    out_ptr_t = generator_forward(params, x, attn_dist, enc_batch_extend_vocab,
                                  temp=2.0, pointer_gen=True)
    out_plain = generator_forward(params, x, pointer_gen=False, vocab_tile=256)
    jax.block_until_ready((out_ptr, out_ptr_t, out_plain))

    ref_ptr = generator_reference(params, x, attn_dist, enc_batch_extend_vocab,
                                  temp=1.0, pointer_gen=True)
    ref_ptr_t = generator_reference(params, x, attn_dist, enc_batch_extend_vocab,
                                    temp=2.0, pointer_gen=True)
    ref_plain = generator_reference(params, x, pointer_gen=False)

    assert out_ptr.shape == (B, T, V)
    assert out_plain.shape == (B, T, V)
    assert float(jnp.max(jnp.abs(out_ptr - ref_ptr))) < 2e-2
    assert float(jnp.max(jnp.abs(out_ptr_t - ref_ptr_t))) < 2e-2
    assert float(jnp.max(jnp.abs(out_plain - ref_plain))) < 2e-2
    print("KERNEL_OK")
</pallas_src>

<mosaic_0001>
module attributes {stable_mosaic.version = 11 : i64} {
  func.func @_pointer_gen_kernel(%arg0: i32, %arg1: i32, %arg2: i32, %arg3: i32, %arg4: memref<1x8x32xf32, #tpu.memory_space<vmem>>, %arg5: memref<32x256xbf16, #tpu.memory_space<vmem>>, %arg6: memref<1x256xf32, #tpu.memory_space<vmem>>, %arg7: memref<1x32xf32, #tpu.memory_space<vmem>>, %arg8: memref<1x1xf32, #tpu.memory_space<smem>>, %arg9: memref<1x8x16xf32, #tpu.memory_space<vmem>>, %arg10: memref<1x16x1xi32, #tpu.memory_space<vmem>>, %arg11: memref<1x8x256xf32, #tpu.memory_space<vmem>>, %arg12: memref<8x1xf32, #tpu.memory_space<vmem>>, %arg13: memref<8x1xf32, #tpu.memory_space<vmem>>, %arg14: memref<8x1xf32, #tpu.memory_space<vmem>>, %arg15: memref<8x16xf32, #tpu.memory_space<vmem>>) attributes {dimension_semantics = [#tpu.dimension_semantics<parallel>, #tpu.dimension_semantics<parallel>, #tpu.dimension_semantics<arbitrary>, #tpu.dimension_semantics<arbitrary>], iteration_bounds = array<i64: 2, 1, 2, 2>, scalar_prefetch = 0 : i64, scratch_operands = 4 : i64, tpu.core_type = #tpu.core_type<tc>, window_params = [{transform_indices = @transform_0, window_bounds = array<i64: 1, 8, 32>}, {transform_indices = @transform_1, window_bounds = array<i64: 32, 256>}, {transform_indices = @transform_2, window_bounds = array<i64: 1, 256>}, {pipeline_mode = #tpu.pipeline_mode<synchronous>, transform_indices = @transform_3, window_bounds = array<i64: 1, 32>}, {transform_indices = @transform_4, window_bounds = array<i64: 1, 1>}, {transform_indices = @transform_5, window_bounds = array<i64: 1, 8, 16>}, {transform_indices = @transform_6, window_bounds = array<i64: 1, 16, 1>}, {transform_indices = @transform_7, window_bounds = array<i64: 1, 8, 256>}]} {
    %c0 = arith.constant 0 : index
    %c0_0 = arith.constant 0 : index
    %c0_1 = arith.constant 0 : index
    %0 = vector.load %arg4[%c0, %c0_0, %c0_1] : memref<1x8x32xf32, #tpu.memory_space<vmem>>, vector<1x8x32xf32>
    %1 = vector.shape_cast %0 : vector<1x8x32xf32> to vector<8x32xf32>
    %c0_i32 = arith.constant 0 : i32
    %2 = arith.cmpi eq, %arg2, %c0_i32 : i32
    %c0_i32_2 = arith.constant 0 : i32
    %3 = arith.cmpi eq, %arg3, %c0_i32_2 : i32
    %4 = arith.andi %2, %3 : i1
    %5 = arith.extui %4 : i1 to i32
    %c0_i32_3 = arith.constant 0 : i32
    %6 = arith.cmpi ne, %5, %c0_i32_3 : i32
    scf.if %6 {
      %c0_11 = arith.constant 0 : index
      %c0_12 = arith.constant 0 : index
      %19 = vector.load %arg7[%c0_11, %c0_12] : memref<1x32xf32, #tpu.memory_space<vmem>>, vector<1x32xf32>
      %20 = vector.broadcast %19 : vector<1x32xf32> to vector<8x32xf32>
      %21 = arith.mulf %1, %20 : vector<8x32xf32>
      %cst_13 = arith.constant dense<0.000000e+00> : vector<8xf32>
      %22 = vector.multi_reduction <add>, %21, %cst_13 [1] : vector<8x32xf32> to vector<8xf32>
      %23 = vector.shape_cast %22 : vector<8xf32> to vector<8x1xf32>
      %c0_14 = arith.constant 0 : index
      %c0_15 = arith.constant 0 : index
      %24 = memref.load %arg8[%c0_14, %c0_15] : memref<1x1xf32, #tpu.memory_space<smem>>
      %25 = vector.broadcast %24 : f32 to vector<8x1xf32>
      %26 = arith.addf %23, %25 : vector<8x1xf32>
      %cst_16 = arith.constant 0.000000e+00 : f32
      %27 = vector.broadcast %cst_16 : f32 to vector<8x1xf32>
      %28 = arith.subf %27, %26 : vector<8x1xf32>
      %29 = math.exp %28 : vector<8x1xf32>
      %cst_17 = arith.constant 1.000000e+00 : f32
      %30 = vector.broadcast %cst_17 : f32 to vector<8x1xf32>
      %31 = arith.addf %30, %29 : vector<8x1xf32>
      %cst_18 = arith.constant 1.000000e+00 : f32
      %32 = vector.broadcast %cst_18 : f32 to vector<8x1xf32>
      %33 = arith.divf %32, %31 : vector<8x1xf32>
      %c0_19 = arith.constant 0 : index
      %c0_20 = arith.constant 0 : index
      %c0_21 = arith.constant 0 : index
      %34 = vector.load %arg9[%c0_19, %c0_20, %c0_21] : memref<1x8x16xf32, #tpu.memory_space<vmem>>, vector<1x8x16xf32>
      %35 = vector.shape_cast %34 : vector<1x8x16xf32> to vector<8x16xf32>
      %cst_22 = arith.constant dense<0xFF800000> : vector<8xf32>
      %36 = vector.multi_reduction <maximumf>, %35, %cst_22 [1] : vector<8x16xf32> to vector<8xf32>
      %37 = vector.shape_cast %36 : vector<8xf32> to vector<8x1xf32>
      %38 = vector.broadcast %37 : vector<8x1xf32> to vector<8x16xf32>
      %39 = arith.subf %35, %38 : vector<8x16xf32>
      %40 = math.exp %39 : vector<8x16xf32>
      %cst_23 = arith.constant 1.000000e+00 : f32
      %41 = vector.broadcast %cst_23 : f32 to vector<8x1xf32>
      %42 = arith.subf %41, %33 : vector<8x1xf32>
      %cst_24 = arith.constant dense<0.000000e+00> : vector<8xf32>
      %43 = vector.multi_reduction <add>, %40, %cst_24 [1] : vector<8x16xf32> to vector<8xf32>
      %44 = vector.shape_cast %43 : vector<8xf32> to vector<8x1xf32>
      %45 = vector.broadcast %44 : vector<8x1xf32> to vector<8x16xf32>
      %46 = arith.divf %40, %45 : vector<8x16xf32>
      %47 = vector.broadcast %42 : vector<8x1xf32> to vector<8x16xf32>
      %48 = arith.mulf %47, %46 : vector<8x16xf32>
      %c0_25 = arith.constant 0 : index
      %c0_26 = arith.constant 0 : index
      %49 = vector.load %arg15[%c0_25, %c0_26] : memref<8x16xf32, #tpu.memory_space<vmem>>, vector<8x16xf32>
      tpu.vector_store %arg15[%c0_25, %c0_26], %48 {strides = array<i32>} : memref<8x16xf32, #tpu.memory_space<vmem>>, vector<8x16xf32>,
      %c0_27 = arith.constant 0 : index
      %c0_28 = arith.constant 0 : index
      %50 = vector.load %arg14[%c0_27, %c0_28] : memref<8x1xf32, #tpu.memory_space<vmem>>, vector<8x1xf32>
      tpu.vector_store %arg14[%c0_27, %c0_28], %33 {strides = array<i32>} : memref<8x1xf32, #tpu.memory_space<vmem>>, vector<8x1xf32>,
      %cst_29 = arith.constant 0xFF800000 : f32
      %51 = vector.broadcast %cst_29 : f32 to vector<8x1xf32>
      %c0_30 = arith.constant 0 : index
      %c0_31 = arith.constant 0 : index
      %52 = vector.load %arg12[%c0_30, %c0_31] : memref<8x1xf32, #tpu.memory_space<vmem>>, vector<8x1xf32>
      tpu.vector_store %arg12[%c0_30, %c0_31], %51 {strides = array<i32>} : memref<8x1xf32, #tpu.memory_space<vmem>>, vector<8x1xf32>,
      %cst_32 = arith.constant 0.000000e+00 : f32
      %53 = vector.broadcast %cst_32 : f32 to vector<8x1xf32>
      %c0_33 = arith.constant 0 : index
      %c0_34 = arith.constant 0 : index
      %54 = vector.load %arg13[%c0_33, %c0_34] : memref<8x1xf32, #tpu.memory_space<vmem>>, vector<8x1xf32>
      tpu.vector_store %arg13[%c0_33, %c0_34], %53 {strides = array<i32>} : memref<8x1xf32, #tpu.memory_space<vmem>>, vector<8x1xf32>,
    } else {
    }
    %7 = arith.truncf %1 : vector<8x32xf32> to vector<8x32xbf16>
    %c0_4 = arith.constant 0 : index
    %c0_5 = arith.constant 0 : index
    %8 = vector.load %arg5[%c0_4, %c0_5] : memref<32x256xbf16, #tpu.memory_space<vmem>>, vector<32x256xbf16>
    %cst = arith.constant dense<0.000000e+00> : vector<8x256xf32>
    %9 = tpu.matmul %7, %8, %cst {dimension_numbers = #tpu.dot_dimension_numbers<[1], [0], [0], [1], [0, 0, 1, 1], [], []>} : vector<8x32xbf16>, vector<32x256xbf16>, vector<8x256xf32> -> vector<8x256xf32>
    %c0_6 = arith.constant 0 : index
    %c0_7 = arith.constant 0 : index
    %10 = vector.load %arg6[%c0_6, %c0_7] : memref<1x256xf32, #tpu.memory_space<vmem>>, vector<1x256xf32>
    %11 = vector.broadcast %10 : vector<1x256xf32> to vector<8x256xf32>
    %12 = arith.addf %9, %11 : vector<8x256xf32>
    %c0_i32_8 = arith.constant 0 : i32
    %13 = arith.cmpi eq, %arg2, %c0_i32_8 : i32
    %14 = arith.extui %13 : i1 to i32
    %c0_i32_9 = arith.constant 0 : i32
    %15 = arith.cmpi ne, %14, %c0_i32_9 : i32
    scf.if %15 {
      %c0_11 = arith.constant 0 : index
      %c0_12 = arith.constant 0 : index
      %19 = vector.load %arg12[%c0_11, %c0_12] : memref<8x1xf32, #tpu.memory_space<vmem>>, vector<8x1xf32>
      %cst_13 = arith.constant dense<0xFF800000> : vector<8xf32>
      %20 = vector.multi_reduction <maximumf>, %12, %cst_13 [1] : vector<8x256xf32> to vector<8xf32>
      %21 = vector.shape_cast %20 : vector<8xf32> to vector<8x1xf32>
      %22 = arith.maximumf %19, %21 : vector<8x1xf32>
      %c0_14 = arith.constant 0 : index
      %c0_15 = arith.constant 0 : index
      %23 = vector.load %arg13[%c0_14, %c0_15] : memref<8x1xf32, #tpu.memory_space<vmem>>, vector<8x1xf32>
      %c0_16 = arith.constant 0 : index
      %c0_17 = arith.constant 0 : index
      %24 = vector.load %arg12[%c0_16, %c0_17] : memref<8x1xf32, #tpu.memory_space<vmem>>, vector<8x1xf32>
      %25 = arith.subf %24, %22 : vector<8x1xf32>
      %26 = math.exp %25 : vector<8x1xf32>
      %27 = arith.mulf %23, %26 : vector<8x1xf32>
      %28 = vector.broadcast %22 : vector<8x1xf32> to vector<8x256xf32>
      %29 = arith.subf %12, %28 : vector<8x256xf32>
      %30 = math.exp %29 : vector<8x256xf32>
      %cst_18 = arith.constant dense<0.000000e+00> : vector<8xf32>
      %31 = vector.multi_reduction <add>, %30, %cst_18 [1] : vector<8x256xf32> to vector<8xf32>
      %32 = vector.shape_cast %31 : vector<8xf32> to vector<8x1xf32>
      %33 = arith.addf %27, %32 : vector<8x1xf32>
      %c0_19 = arith.constant 0 : index
      %c0_20 = arith.constant 0 : index
      %34 = vector.load %arg13[%c0_19, %c0_20] : memref<8x1xf32, #tpu.memory_space<vmem>>, vector<8x1xf32>
      tpu.vector_store %arg13[%c0_19, %c0_20], %33 {strides = array<i32>} : memref<8x1xf32, #tpu.memory_space<vmem>>, vector<8x1xf32>,
      %c0_21 = arith.constant 0 : index
      %c0_22 = arith.constant 0 : index
      %35 = vector.load %arg12[%c0_21, %c0_22] : memref<8x1xf32, #tpu.memory_space<vmem>>, vector<8x1xf32>
      tpu.vector_store %arg12[%c0_21, %c0_22], %22 {strides = array<i32>} : memref<8x1xf32, #tpu.memory_space<vmem>>, vector<8x1xf32>,
    } else {
    }
    %c1_i32 = arith.constant 1 : i32
    %16 = arith.cmpi eq, %arg2, %c1_i32 : i32
    %17 = arith.extui %16 : i1 to i32
    %c0_i32_10 = arith.constant 0 : i32
    %18 = arith.cmpi ne, %17, %c0_i32_10 : i32
    scf.if %18 {
      %19 = tpu.iota {dimensions = array<i32: 1>} : vector<16x256xi32>
      %c256_i32 = arith.constant 256 : i32
      %20 = arith.muli %arg3, %c256_i32 : i32
      %21 = vector.broadcast %20 : i32 to vector<16x256xi32>
      %22 = arith.addi %19, %21 : vector<16x256xi32>
      %c0_11 = arith.constant 0 : index
      %c0_12 = arith.constant 0 : index
      %c0_13 = arith.constant 0 : index
      %23 = vector.load %arg10[%c0_11, %c0_12, %c0_13] : memref<1x16x1xi32, #tpu.memory_space<vmem>>, vector<1x16x1xi32>
      %24 = vector.shape_cast %23 : vector<1x16x1xi32> to vector<16x1xi32>
      %25 = vector.broadcast %24 : vector<16x1xi32> to vector<16x256xi32>
      %26 = arith.cmpi eq, %22, %25 : vector<16x256xi32>
      %27 = arith.extui %26 : vector<16x256xi1> to vector<16x256xi32>
      %28 = arith.sitofp %27 : vector<16x256xi32> to vector<16x256xf32>
      %29 = arith.truncf %28 : vector<16x256xf32> to vector<16x256xbf16>
      %c0_14 = arith.constant 0 : index
      %c0_15 = arith.constant 0 : index
      %30 = vector.load %arg15[%c0_14, %c0_15] : memref<8x16xf32, #tpu.memory_space<vmem>>, vector<8x16xf32>
      %31 = arith.truncf %30 : vector<8x16xf32> to vector<8x16xbf16>
      %cst_16 = arith.constant dense<0.000000e+00> : vector<8x256xf32>
      %32 = tpu.matmul %31, %29, %cst_16 {dimension_numbers = #tpu.dot_dimension_numbers<[1], [0], [0], [1], [0, 0, 1, 1], [], []>} : vector<8x16xbf16>, vector<16x256xbf16>, vector<8x256xf32> -> vector<8x256xf32>
      %c0_17 = arith.constant 0 : index
      %c0_18 = arith.constant 0 : index
      %33 = vector.load %arg14[%c0_17, %c0_18] : memref<8x1xf32, #tpu.memory_space<vmem>>, vector<8x1xf32>
      %c0_19 = arith.constant 0 : index
      %c0_20 = arith.constant 0 : index
      %34 = vector.load %arg13[%c0_19, %c0_20] : memref<8x1xf32, #tpu.memory_space<vmem>>, vector<8x1xf32>
      %35 = arith.divf %33, %34 : vector<8x1xf32>
      %c0_21 = arith.constant 0 : index
      %c0_22 = arith.constant 0 : index
      %36 = vector.load %arg12[%c0_21, %c0_22] : memref<8x1xf32, #tpu.memory_space<vmem>>, vector<8x1xf32>
      %37 = vector.broadcast %36 : vector<8x1xf32> to vector<8x256xf32>
      %38 = arith.subf %12, %37 : vector<8x256xf32>
      %39 = math.exp %38 : vector<8x256xf32>
      %40 = vector.broadcast %35 : vector<8x1xf32> to vector<8x256xf32>
      %41 = arith.mulf %39, %40 : vector<8x256xf32>
      %42 = arith.addf %41, %32 : vector<8x256xf32>
      %43 = math.log %42 : vector<8x256xf32>
      %c0_23 = arith.constant 0 : index
      %c0_24 = arith.constant 0 : index
      %c0_25 = arith.constant 0 : index
      %44 = vector.load %arg11[%c0_23, %c0_24, %c0_25] : memref<1x8x256xf32, #tpu.memory_space<vmem>>, vector<1x8x256xf32>
      %45 = vector.shape_cast %44 : vector<1x8x256xf32> to vector<8x256xf32>
      %46 = vector.shape_cast %43 : vector<8x256xf32> to vector<1x8x256xf32>
      tpu.vector_store %arg11[%c0_23, %c0_24, %c0_25], %46 {strides = array<i32>} : memref<1x8x256xf32, #tpu.memory_space<vmem>>, vector<1x8x256xf32>,
    } else {
    }
    return
  }
  func.func @transform_0(%arg0: i32, %arg1: i32, %arg2: i32, %arg3: i32) -> (i32, i32, i32) {
    %c0_i32 = arith.constant 0 : i32
    %c0_i32_0 = arith.constant 0 : i32
    return %arg0, %arg1, %c0_i32 : i32, i32, i32
  }
  func.func @transform_1(%arg0: i32, %arg1: i32, %arg2: i32, %arg3: i32) -> (i32, i32) {
    %c0_i32 = arith.constant 0 : i32
    %c0_i32_0 = arith.constant 0 : i32
    return %c0_i32, %arg3 : i32, i32
  }
  func.func @transform_2(%arg0: i32, %arg1: i32, %arg2: i32, %arg3: i32) -> (i32, i32) {
    %c0_i32 = arith.constant 0 : i32
    %c0_i32_0 = arith.constant 0 : i32
    return %c0_i32, %arg3 : i32, i32
  }
  func.func @transform_3(%arg0: i32, %arg1: i32, %arg2: i32, %arg3: i32) -> (i32, i32) {
    %c0_i32 = arith.constant 0 : i32
    %c0_i32_0 = arith.constant 0 : i32
    %c0_i32_1 = arith.constant 0 : i32
    return %c0_i32, %c0_i32_0 : i32, i32
  }
  func.func @transform_4(%arg0: i32, %arg1: i32, %arg2: i32, %arg3: i32) -> (i32, i32) {
    %c0_i32 = arith.constant 0 : i32
    %c0_i32_0 = arith.constant 0 : i32
    %c0_i32_1 = arith.constant 0 : i32
    return %c0_i32, %c0_i32_0 : i32, i32
  }
  func.func @transform_5(%arg0: i32, %arg1: i32, %arg2: i32, %arg3: i32) -> (i32, i32, i32) {
    %c0_i32 = arith.constant 0 : i32
    %c0_i32_0 = arith.constant 0 : i32
    return %arg0, %arg1, %c0_i32 : i32, i32, i32
  }
  func.func @transform_6(%arg0: i32, %arg1: i32, %arg2: i32, %arg3: i32) -> (i32, i32, i32) {
    %c0_i32 = arith.constant 0 : i32
    %c0_i32_0 = arith.constant 0 : i32
    %c0_i32_1 = arith.constant 0 : i32
    return %arg0, %c0_i32, %c0_i32_0 : i32, i32, i32
  }
  func.func @transform_7(%arg0: i32, %arg1: i32, %arg2: i32, %arg3: i32) -> (i32, i32, i32) {
    %0 = arith.muli %arg2, %arg3 : i32
    %c0_i32 = arith.constant 0 : i32
    return %arg0, %arg1, %0 : i32, i32, i32
  }
}

</mosaic_0001>

<bundles_post_ra>
// kernel: tpu_custom_call.1
= control target key start
LH: loop header
LB: loop body
LE: loop exit
PB: predicated region body
PF: predicated region fallthrough
CT: control target
= control target key end

     0   :  { %s1576_s0 = inlined_call_operand.vmem [shape: f32[2,8,32], index: 0, kind: input, shape index: {}]   ;;  %s1577_s1 = inlined_call_operand.hbm [shape: bf16[32,512], index: 1, kind: input, shape index: {}]   ;;  %s1578_s2 = inlined_call_operand.vmem [shape: f32[1,512], index: 2, kind: input, shape index: {}]   ;;  %s1579_s3 = inlined_call_operand.vmem [shape: f32[1,32], index: 3, kind: input, shape index: {}]   ;;  %s1580_s4 = inlined_call_operand.<no memory space> [shape: f32[1,1], index: 4, kind: input, shape index: {}]   ;;  %s1581_s5 = inlined_call_operand.vmem [shape: f32[2,8,16], index: 5, kind: input, shape index: {}]   ;;  %s1582_s6 = inlined_call_operand.vmem [shape: s32[2,16,1], index: 6, kind: input, shape index: {}]   ;;  %s1583_s7 = inlined_call_operand.hbm [shape: f32[2,8,512], index: 7, kind: output, shape index: {}]  }
   0x1   :  { %1593 = sst [smem:[#allocation21_spill]] %s1577_s1 }
   0x2   :  { %1594 = sst [smem:[#allocation22_spill]] %s1579_s3 }
   0x3   :  { %1595 = sst [smem:[#allocation23_spill]] %s1583_s7 }
   0x4   :  { %12 = sst [smem:[#allocation6]] %s1580_s4 }
   0x5   :  { %13 = vsyncpa [#allocation8], 0 }
   0x6   :  { %15 = vsyncpa [#allocation8 + $0x1], 0 }
   0x7   :  { %16 = vsyncpa [#allocation9], 0 }
   0x8   :  { %18 = vsyncpa [#allocation9 + $0x1], 0  ;;  %s1288_s26 = smov 0   ;;  %s1290_s27 = smov 0  }
   0x9   :  { %s1292_s28 = smov 0   ;;  %s1294_s29 = smov 0  }
   0xa   :  { %s1296_s30 = smov 0   ;;  %s1298_s8 = smov 0  }
   0xb   :  { %s1300_s9 = smov 0   ;;  %s1302_s10 = smov 0  }
   0xc   :  { %s1304_s4 = smov 0   ;;  %s1306_s11 = smov 0  }
   0xd   :  { %s1308_s12 = smov 0   ;;  %s1310_s13 = smov 0  }
   0xe   :  { %s1312_s14 = smov 0  }
   0xf LB: > { %1596 = sst [smem:[#allocation13_spill]] %s1204_s8  ;;  %s867_s15 = sadd.s32 4294967295, %s1232_s14   ;;  %s1232_s14 = sphi %s1312_s14, %s24_s14   ;;  %s1228_s13 = sphi %s1310_s13, %s1622_s13   ;;  %s1224_s12 = sphi %s1308_s12, %s1628_s12   ;;  %s1220_s11 = sphi %s1306_s11, %s1620_s11   ;;  %s1216_s4 = sphi %s1304_s4, %s1619_s4   ;;  %s1212_s10 = sphi %s1302_s10, %s1618_s10   ;;  %s1208_s9 = sphi %s1300_s9, %s1617_s9   ;;  %s1204_s8 = sphi %s1298_s8, %s1616_s8   ;;  %s1200_s30 = sphi %s1296_s30, %s1627_s30   ;;  %s1196_s29 = sphi %s1294_s29, %s1626_s29   ;;  %s1192_s28 = sphi %s1292_s28, %s1625_s28   ;;  %s1188_s27 = sphi %s1290_s27, %s1624_s27   ;;  %s1184_s26 = sphi %s1288_s26, %s1623_s26  }
  0x10   : > { %1597 = sst [smem:[#allocation14_spill]] %s1220_s11  ;;  %s39_s17 = sadd.s32 1, %s1220_s11 }
  0x11   : > { %1598 = sst [smem:[#allocation15_spill]] %s1224_s12  ;;  %s42_s18 = sadd.s32 1, %s1224_s12 }
  0x12   : > { %1599 = sst [smem:[#allocation16_spill]] %s1228_s13  ;;  %p40_p0 = scmp.ge.s32.totalorder %s39_s17, 2 }
  0x13   : > { %s50_s19 = sadd.s32 1, %s1228_s13  ;;  %s85_s20 = sadd.s32 1, %s1204_s8 }
  0x14   : > { %p92_p1 = scmp.ne.s32.totalorder %s1204_s8, %s1200_s30  ;;  %s1630_s17 = smov (%p40_p0, %s39_s17), 0 }
  0x15   : > { %1600 = sst [smem:[#allocation17_spill]] %s1630_s17  ;;  %s1632_s18 = smov (!%p40_p0, %s42_s18), %s1224_s12 }
  0x16   : > { %s82_s21 = ssub.s32 %s1220_s11, %s1630_s17  ;;  %p93_p2 = scmp.eq.s32.totalorder %s1232_s14, 0 }
  0x17   : > { %p44_p3 = scmp.ge.s32.totalorder %s1632_s18, 2  ;;  %p83_p4 = scmp.eq.s32.totalorder %s82_s21, 0 }
  0x18   : > { %p1367_p5 = por %p93_p2, %p92_p1  ;;  %p98_p6 = scmp.ne.s32.totalorder %s1200_s30, %s1196_s29 }
  0x19   : > { %s1634_s18 = smov (%p44_p3, %s1632_s18), 0  ;;  %s1636_s19 = smov (!%p44_p3, %s50_s19), %s1228_s13 }
  0x1a   : > { %1602 = sst [smem:[#allocation18_spill]] %s1634_s18  ;;  %p52_p7 = scmp.ge.s32.totalorder %s1636_s19, 2 }
  0x1b   : > { %s1377_s23 = scalar_select %p83_p4, %s1204_s8, %s85_s20  }
  0x1c   : > { %p99_p8 = scmp.eq.s32.totalorder %s867_s15, 0  ;;  %s230_s24 = smul.u32 %s1220_s11, %s1224_s12 }
  0x1d   : > { %1603 = sst [smem:[#allocation19_spill]] %s1377_s23  ;;  %s239_s25 = sadd.s32 1, %s1192_s28 }
  0x1e   : > { %s1638_s19 = smov (%p52_p7, %s1636_s19), 0  ;;  %p1386_p9 = por %p99_p8, %p98_p6 }
  0x1f   : > { %1604 = sst [smem:[#allocation20_spill]] %s1638_s19  ;;  %s231_s21 = smul.u32 %s1634_s18, %s1630_s17 }
  0x20   : > { %s232_s20 = ssub.s32 %s1228_s13, %s1638_s19  ;;  %p249_p10 = scmp.ne.s32.totalorder %s1192_s28, %s1188_s27 }
  0x21   : > { %s235_s16 = ssub.s32 %s230_s24, %s231_s21  ;;  %p250_p11 = scmp.eq.s32.totalorder %s867_s15, 7 }
  0x22   : > { %s236_s23 = sor.u32 %s235_s16, %s232_s20  ;;  %p255_p12 = scmp.ne.s32.totalorder %s1188_s27, %s1184_s26 }
  0x23   : > { %p237_p13 = scmp.eq.s32.totalorder %s236_s23, 0  ;;  %p1400_p0 = por %p250_p11, %p249_p10 }
  0x24   : > { %s1607_s7 = sadd.s32 4294967294, %s1232_s14   ;;  %p920_p3 = scmp.lt.s32.totalorder %s1232_s14, 8 }
  0x25   : > { %p256_p1 = scmp.eq.s32.totalorder %s1607_s7, 7  ;;  %s292_s24 = sand.u32 1, %s1204_s8  }
  0x26   : > { %s1407_s3 = scalar_select %p237_p13, %s1192_s28, %s239_s25  }
  0x27   : > { %p1409_p2 = por %p256_p1, %p255_p12  ;;  %s906_s21 = sshll.u32 %s1220_s11, 7 }
  0x28   : > { %s871_s15 = sshll.u32 %s292_s24, 5  ;;  %s1609_s1 = sld [smem:[#allocation21_spill]] }
  0x29   : > { %s296_s19 = scalar_lea.vmem [#allocation7], %s871_s15  ;;  %p1421_p4 = pnand %p920_p3, %p1367_p5 }
  0x2a   : > { %s303_s17 = sshll.u32 %s296_s19, 4  ;;  %p874_p6 = scmp.ge.s32.totalorder %s1232_s14, 1  ;;  %s304_s17 = int_to_ptr.vmem [resolvable:$true] %s303_s17 }
  0x2b   : > { %s293_s7 = scalar_lea.sflag [#allocation8], %s292_s24  ;;  %p1070_p7 = pneg %p1421_p4 }
  0x2c   : > { %s1081_s25 = scalar_lea.vmem %s304_s17, 512  ;;  %s1234_s11 = smov [#allocation7]  }
  0x2d   : > { %p1082_p8 = scmp.ne.s32.totalorder %s304_s17, %s1081_s25  ;;  %s1086_s16 = sshll.u32 %s1234_s11, 4  ;;  %s1087_s16 = int_to_ptr.vmem [resolvable:$false] %s1086_s16 }
  0x2e   : > { %s302_s23 = scalar_lea.hbm %s1609_s1, %s906_s21  ;;  %s1088_s21 = scalar_lea.vmem %s1087_s16, 1024 }
  0x2f   : > { %p1084_p10 = pnand %p1082_p8, %p1070_p7  ;;  %p1089_p12 = scmp.lt.s32.totalorder %s304_s17, %s1087_s16 }
  0x30   : > { %p1090_p13 = scmp.lt.s32.totalorder %s1088_s21, %s1081_s25 }
  0x31   : > { %p1085_p11 = pneg %p1084_p10 }
  0x32   : > { %p1091_p5 = por %p1090_p13, %p1089_p12 }
  0x34   : > { %p1092_p1 = pnand %p1091_p5, %p1085_p11 }
  0x36   : > { %1095 = shalt.err (!%p1092_p1)
}
  0x37   : > { %s1235_s19 = smov 256   ;;  %s1236_s22 = smov 128  }
  0x38   : > { %s1237_s24 = smov 8   ;;  %p337_p3 = scmp.lt.s32.totalorder %s1232_s14, 9 }
  0x39   : > { %915 = dma.hbm_to_vmem [thread:$0]  (!%p1421_p4), %s302_s23, 512, %s304_s17, %s293_s7, %s1235_s19, %s1236_s22, %s1237_s24  }
  0x3a   : > { %p338_p7 = pnand %p874_p6, %p337_p3 }
  0x3b   : > { %s343_s11 = sand.u32 (!%p338_p7), 1, %s1200_s30  }
  0x3c   : > { %341 = sbr.rel (%p338_p7) target bundleno = 1419 (0x58b), region = 48  ;;  %s875_s15 = sshll.u32 (!%p338_p7), %s343_s11, 5 }
  0x3d   : > { %s344_s20 = scalar_lea.sflag (!%p338_p7), [#allocation8], %s343_s11  ;;  %s1434_s25 = scalar_lea.vmem (!%p338_p7), [#allocation7], %s875_s15 }
  0x41   : > { %1175 = dma.done.wait (%p1386_p9), %s344_s20, 512  }
  0x42   : > { %1177 = vsyncadd (%p1386_p9), %s344_s20, 4294966784  ;;  %p401_p4 = scmp.lt.s32.totalorder %s1216_s4, 1  ;;  %s1592_s13 = sand.u32 1, %s1188_s27  }
  0x43   : > { %s876_s17 = sshll.u32 %s1592_s13, 4  ;;  %s878_s23 = sshll.u32 %s1208_s9, 1 }
  0x44   : > { %s402_s7 = scalar_select %p401_p4, %s1216_s4, 1 }
  0x45   : > { %p410_p6 = scmp.lt.s32.totalorder %s878_s23, 3  ;;  %p430_p9 = scmp.eq.s32.totalorder %s1212_s10, 0 }
  0x46   : > { %s877_s16 = sshll.u32 %s402_s7, 3  ;;  %s907_s21 = sshll.u32 %s402_s7, 4 }
  0x47   : > { %s407_s29 = scalar_lea.vmem %s1576_s0, %s877_s16  ;;  %s420_s15 = scalar_lea.vmem %s1581_s5, %s877_s16 }
  0x48   : > { %s1455_s8 = scalar_lea.vmem %s1582_s6, %s907_s21  ;;  %v429_v0 = vld [vmem:[%s407_s29] sm:$0xff]  ;;  %s1640_s23 = smov (!%p410_p6, %s878_s23), 3 }
  0x49   : > { %p431_p8 = scmp.eq.s32.totalorder %s1208_s9, 0  ;;  %s412_s19 = scalar_lea.vmem %s1578_s2, %s1640_s23 }
  0x4a   : > { %s1465_s22 = scalar_lea.vmem [#allocation10], %s876_s17 }
  0x4b   : > { %p432_p10 = pnand %p431_p8, %p430_p9 }
  0x4c   : > { %s1611_s21 = sld [smem:[#allocation22_spill]] (!%p432_p10) }
  0x4d   : > { %435 = sbr.rel (%p432_p10) target bundleno = 398 (0x18e), region = 56  ;;  %s448_s13 = sld [smem:[#allocation6]] (!%p432_p10) }
  0x52   : > { %v457_v1 = vld [vmem:[%s420_s15] sm:$0xff]  ;;  %vm458_vm0 = vcmask 130048   ;;  %vm444_vm1 = vcmask 261120   ;;  %vm473_vm2 = vcmask 7168   ;;  %v1238_v6 = vmov -inf  }
  0x53   : > { %v882_v2 = vld [vmem:[%s1611_s21] ss:$0 sm:$0xff]  ;;  %v459_v3 = vsel %vm458_vm0, %v457_v1, -inf  ;;  %475 = vst.msk [vmem:[#allocation2] sm:$0xff] %vm473_vm2, %v1238_v6  ;;  %v1239_v7 = vmov 0.0   ;;  %v449_v10 = vstv %s448_s13 }
  0x54   : > { %v443_v4 = vmul.f32 %v882_v2, %v429_v0  ;;  %460 = vmax.xlane.f32.xlu0 %v459_v3  ;;  %476 = vst.msk [vmem:[#allocation3] sm:$0xff] %vm473_vm2, %v1239_v7 }
  0x56   : > { %v445_v5 = vsel %vm444_vm1, %v443_v4, 0.0 }
  0x58   : > { %446 = vadd.xlane.f32.xlu0 %v445_v5 }
  0xdd   : > { %v461_v8 = vpop.xlane.xlu0 %460 }
  0xde   : > { %v462_v9 = vsub.f32 %v457_v1, %v461_v8 }
  0xe0   : > { %v463_v11 = vmul.f32 1.442695, %v462_v9 }
  0xe1   : > { %v447_v12 = vpop.xlane.xlu0 %446 }
  0xe2   : > { %1035 = vpow2.f32 %v463_v11  ;;  %v450_v13 = vadd.f32 %v449_v10, %v447_v12 }
  0xe4   : > { %v451_v14 = vsub.f32 0.0, %v450_v13 }
  0xe6   : > { %v452_v15 = vmul.f32 1.442695, %v451_v14 }
  0xe8   : > { %1037 = vpow2.f32 %v452_v15 }
  0xef   : > { %v1036_v16 = vpop.eup %1035 }
  0xf0   : > { %v466_v17 = vsel %vm458_vm0, %v1036_v16, 0.0 }
  0xf1   : > { %467 = vadd.xlane.f32.xlu1 %v466_v17 }
  0xf5   : > { %v1038_v18 = vpop.eup %1037 }
  0xf6   : > { %v454_v19 = vadd.f32 1.0, %v1038_v18 }
  0xf8   : > { %1039 = vrcp.f32 %v454_v19 }
 0x105   : > { %v1040_v20 = vpop.eup %1039 }
 0x106   : > { %474 = vst.msk [vmem:[#allocation4] sm:$0xff] %vm473_vm2, %v1040_v20  ;;  %v465_v22 = vsub.f32 1.0, %v1040_v20 }
 0x17a   : > { %v468_v21 = vpop.xlane.xlu1 %467 }
 0x17b   : > { %1041 = vrcp.f32 %v468_v21 }
 0x188   : > { %v1042_v23 = vpop.eup %1041 }
 0x189   : > { %v470_v24 = vmul.f32 %v1042_v23, %v1036_v16 }
 0x18b   : > { %v471_v25 = vmul.f32 %v470_v24, %v465_v22 }
 0x18d   : > { %472 = vst.msk [vmem:[#allocation5] sm:$0xff] %vm458_vm0, %v471_v25 }
 0x18e PF: > { %v1043_v26 = vld [vmem:[%s1434_s25 + $0x14] ss:$8 sps:$4 sm:$0xff]   ;;  %v1045_v27 = vld [vmem:[%s1434_s25 + $0x10] ss:$8 sps:$4 sm:$0xff]   ;;  %v1240_v28 = vmov 0   ;;  %v477_v31 = vpack.c.bf16 %v429_v0, %v429_v0  ;;  %vm514_vm3 = vcmask 261120   ;;  %v484_v32 = vlaneseq }
 0x18f   : > { %550 = vmatprep.mubr.bf16.mxu0 %v1240_v28  ;;  %530 = vmatprep.subr.bf16.mxu0 %v1043_v26  ;;  %v1046_v29 = vld [vmem:[%s1434_s25 + $0x4] ss:$8 sps:$4 sm:$0xff]   ;;  %v1048_v30 = vld [vmem:[%s1434_s25] ss:$8 sps:$4 sm:$0xff]   ;;  %p888_p11 = scmp.ne.s32.totalorder %s1212_s10, 0 }
 0x190   : > { %531 = vmatpush1.bf16.msra.mxu0 %v1045_v27  ;;  %v485_v33 = vshrl.u32 %v484_v32, 7  ;;  %v482_v35 = vld [vmem:[%s412_s19] sm:$0x3] }
 0x191   : > { %532 = vmatprep.subr.bf16.mxu0 %v1046_v29 }
 0x192   : > { %v486_v34 = vsub.s32 0, %v485_v33  ;;  %v490_v36 = vsub.s32 1, %v485_v33 }
 0x194   : > { %533 = vmatpush1.bf16.msra.mxu0 %v1048_v30  ;;  %v487_v37 = vrot.slane %v482_v35, %v486_v34  ;;  %v491_v38 = vrot.slane %v482_v35, %v490_v36 }
 0x197   : > { %887 = vmatmul.mubr.msk.bf16.vlgmr.msra.gmra.mxu0 %vm514_vm3, %v477_v31 }
 0x257   : > { %v552_v39 = vpop.f32.mrf.mxu0 }
 0x258   : > { %v1486_v40 = vadd.f32 %v552_v39, %v487_v37 }
 0x259   : > { %v554_v41 = vpop.f32.mrf.mxu0  ;;  %561 = sbr.rel (%p888_p11) target bundleno = 1034 (0x40a), region = 60 }
 0x25a   : > { %v1488_v42 = vadd.f32 %v554_v41, %v491_v38 }
 0x25b   : > { %v556_v43 = vpop.f32.mrf.mxu0 }
 0x25d   : > { %v557_v44 = vpop.f32.mrf.mxu0 }
 0x25e   : > { %v563_v45 = vmax.f32 %v1486_v40, %v1488_v42  ;;  %v1241_v46 = vmov 0   ;;  %v562_v47 = vld [vmem:[#allocation2] sm:$0xff]  ;;  %vm587_vm4 = vcmask 7168   ;;  %v567_v61 = vld [vmem:[#allocation3] sm:$0xff] }
 0x25f   : > { %1049 = vset.pattern.permute.xlu0 %v1241_v46 }
 0x260   : > { %564 = vmax.xlane.f32.xlu0 %v563_v45 }
 0x2e9   : > { %v565_v48 = vpop.xlane.xlu0 %564 }
 0x2ea   : > { %v566_v49 = vmax.f32 %v562_v47, %v565_v48 }
 0x2ec   : > { %v568_v50 = vsub.f32 %v562_v47, %v566_v49  ;;  %589 = vst.msk [vmem:[#allocation2] sm:$0xff] %vm587_vm4, %v566_v49  ;;  %574 = vperm.xlu0 %1049, %v566_v49  }
 0x2ee   : > { %v569_v59 = vmul.f32 1.442695, %v568_v50 }
 0x367   : > { %v575_v51 = vpop.permute.xlu0 %574 }
 0x368   : > { %v577_v52 = vsub.f32 %v1486_v40, %v575_v51  ;;  %v578_v53 = vsub.f32 %v1488_v42, %v575_v51 }
 0x36a   : > { %v579_v54 = vmul.f32 1.442695, %v577_v52  ;;  %v581_v55 = vmul.f32 1.442695, %v578_v53 }
 0x36c   : > { %1050 = vpow2.f32 %v579_v54 }
 0x36d   : > { %1052 = vpow2.f32 %v581_v55 }
 0x36e   : > { %1054 = vpow2.f32 %v569_v59 }
 0x379   : > { %v1051_v56 = vpop.eup %1050 }
 0x37a   : > { %v1053_v57 = vpop.eup %1052 }
 0x37b   : > { %v583_v58 = vadd.f32 %v1053_v57, %v1051_v56  ;;  %v1055_v60 = vpop.eup %1054 }
 0x37c   : > { %v571_v62 = vmul.f32 %v1055_v60, %v567_v61 }
 0x37d   : > { %584 = vadd.xlane.f32.xlu1 %v583_v58 }
 0x406   : > { %v585_v63 = vpop.xlane.xlu1 %584 }
 0x407   : > { %v586_v0 = vadd.f32 %v585_v63, %v571_v62 }
 0x409   : > { %588 = vst.msk [vmem:[#allocation3] sm:$0xff] %vm587_vm4, %v586_v0 }
 0x40a PF: > { %p889_p12 = scmp.ne.s32.totalorder %s1212_s10, 1 }
 0x40b   : > { %s890_s25 = sshll.u32 (!%p889_p12), %s1208_s9, 8 }
 0x40c   : > { %593 = sbr.rel (%p889_p12) target bundleno = 1392 (0x570), region = 64 }
 0x411   : > { %v601_v1 = vld [vmem:[%s1455_s8] sm:$0xff]  ;;  %v1242_v2 = vmov 0   ;;  %v602_v3 = vld [vmem:[%s1455_s8 + $0x8] sm:$0xff]  ;;  %v670_v6 = vld [vmem:[#allocation4] sm:$0xff]  ;;  %v595_v9 = vand.u32 127, %v484_v32  ;;  %v598_v10 = vstv %s890_s25  ;;  %vm625_vm11 = vcmask 130048  }
 0x412   : > { %1056 = vset.pattern.permute.xlu0 %v1242_v2  ;;  %661 = vmatprep.mubr.bf16.mxu0 %v1242_v2  ;;  %v674_v4 = vld [vmem:[#allocation2] sm:$0xff]  ;;  %v671_v5 = vld [vmem:[#allocation3] sm:$0xff]  ;;  %v623_v16 = vld [vmem:[#allocation5] sm:$0xff]  ;;  %v1243_v17 = vmov 1.0|1.0  }
 0x413   : > { %604 = vperm.xlu0 %1056, %v601_v1   ;;  %1057 = vset.pattern.permute.xlu1 %v1242_v2  ;;  %1058 = vrcp.f32 %v671_v5  ;;  %v596_v11 = vadd.s32 128, %v595_v9  ;;  %v599_v13 = vadd.s32 %v598_v10, %v595_v9  ;;  %v624_v18 = vpack.c.bf16 %v623_v16, %v623_v16 }
 0x414   : > { %677 = vperm.xlu1 %1057, %v674_v4  }
 0x415   : > { %v600_v14 = vadd.s32 %v598_v10, %v596_v11 }
 0x417   : > { %607 = vperm.xlu0 %1056, %v602_v3  }
 0x420   : > { %v1059_v7 = vpop.eup %1058 }
 0x421   : > { %v673_v8 = vmul.f32 %v1059_v7, %v670_v6 }
 0x423   : > { %688 = vperm.xlu1 %1057, %v673_v8  }
 0x48e   : > { %v605_v12 = vpop.permute.xlu0 %604 }
 0x48f   : > { %vm609_vm5 = vcmp.eq.s32.totalorder %v599_v13, %v605_v12  ;;  %vm610_vm9 = vcmp.eq.s32.totalorder %v600_v14, %v605_v12  ;;  %v678_v19 = vpop.permute.xlu1 %677 }
 0x490   : > { %v680_v20 = vsub.f32 %v1486_v40, %v678_v19  ;;  %v681_v21 = vsub.f32 %v1488_v42, %v678_v19 }
 0x492   : > { %v608_v15 = vpop.permute.xlu0 %607  ;;  %v682_v22 = vmul.f32 1.442695, %v680_v20  ;;  %v684_v23 = vmul.f32 1.442695, %v681_v21 }
 0x493   : > { %vm611_vm6 = vcmp.eq.s32.totalorder %v599_v13, %v608_v15  ;;  %vm612_vm7 = vcmp.eq.s32.totalorder %v600_v14, %v608_v15 }
 0x494   : > { %vm897_vm8 = vmpackc.low %vm611_vm6, %vm609_vm5  ;;  %1060 = vpow2.f32 %v682_v22 }
 0x495   : > { %vm895_vm10 = vmpackc.low %vm612_vm7, %vm610_vm9  ;;  %1062 = vpow2.f32 %v684_v23 }
 0x496   : > { %896 = vmatprep.subr.msk.bf16.mxu0 %vm895_vm10, %v1243_v17 }
 0x497   : > { %898 = vmatpush1.bf16.msk.msra.mxu0 %vm897_vm8, %v1243_v17 }
 0x49a   : > { %899 = vmatmul.mubr.msk.bf16.vlgmr.msra.gmra.mxu0 %vm625_vm11, %v624_v18 }
 0x49e   : > { %v689_v25 = vpop.permute.xlu1 %688 }
 0x4a1   : > { %v1061_v24 = vpop.eup %1060 }
 0x4a2   : > { %v1063_v26 = vpop.eup %1062  ;;  %v691_v27 = vmul.f32 %v1061_v24, %v689_v25 }
 0x4a3   : > { %v692_v29 = vmul.f32 %v1063_v26, %v689_v25 }
 0x55a   : > { %v663_v28 = vpop.f32.mrf.mxu0 }
 0x55b   : > { %v693_v30 = vadd.f32 %v691_v27, %v663_v28 }
 0x55c   : > { %v665_v31 = vpop.f32.mrf.mxu0 }
 0x55d   : > { %1064 = vlog2.f32 %v693_v30  ;;  %v694_v32 = vadd.f32 %v692_v29, %v665_v31 }
 0x55e   : > { %v667_v33 = vpop.f32.mrf.mxu0 }
 0x55f   : > { %1066 = vlog2.f32 %v694_v32 }
 0x560   : > { %v668_v34 = vpop.f32.mrf.mxu0 }
 0x56a   : > { %v1065_v35 = vpop.eup %1064 }
 0x56b   : > { %v696_v36 = vmul.f32 0.6931472, %v1065_v35 }
 0x56c   : > { %v1067_v37 = vpop.eup %1066 }
 0x56d   : > { %699 = vst [vmem:[%s1465_s22] sm:$0xff] %v696_v36  ;;  %v698_v38 = vmul.f32 0.6931472, %v1067_v37 }
 0x56f   : > { %700 = vst [vmem:[%s1465_s22 + $0x8] sm:$0xff] %v698_v38 }
 0x570 PF: > { %s709_s8 = smul.u32 %s1208_s9, %s1212_s10  ;;  %s902_s23 = sshll.u32 %s1216_s4, 2 }
 0x571   : > { %s721_s24 = sshll.u32 %s1465_s22, 4  ;;  %s1612_s16 = sld [smem:[#allocation23_spill]]  ;;  %s722_s24 = int_to_ptr.vmem [resolvable:$true] %s721_s24 }
 0x572   : > { %s901_s11 = sshll.u32 %s709_s8, 1  ;;  %s1613_s21 = sand.u32 1, %s1188_s27  }
 0x573   : > { %s717_s15 = sadd.s32 %s902_s23, %s901_s11  ;;  %s702_s13 = scalar_lea.sflag [#allocation9], %s1613_s21 }
 0x574   : > { %s903_s20 = sshll.u32 %s717_s15, 7  ;;  %s1096_s17 = scalar_lea.vmem %s722_s24, 256 }
 0x575   : > { %p1097_p13 = scmp.ne.s32.totalorder %s722_s24, %s1096_s17  ;;  %s1244_s29 = smov [#allocation10]  }
 0x576   : > { %s1100_s25 = sshll.u32 %s1244_s29, 4  ;;  %s1101_s25 = int_to_ptr.vmem [resolvable:$false] %s1100_s25 }
 0x577   : > { %s719_s1 = scalar_lea.hbm %s1612_s16, %s903_s20  ;;  %p1098_p5 = pnand %p1097_p13, %p1400_p0 }
 0x578   : > { %s1102_s9 = scalar_lea.vmem %s1101_s25, 512  ;;  %p1103_p3 = scmp.lt.s32.totalorder %s722_s24, %s1101_s25 }
 0x579   : > { %p1099_p1 = pneg %p1098_p5  ;;  %p1104_p7 = scmp.lt.s32.totalorder %s1102_s9, %s1096_s17 }
 0x57b   : > { %p1105_p4 = por %p1104_p7, %p1103_p3 }
 0x57d   : > { %p1106_p6 = pnand %p1105_p4, %p1099_p1 }
 0x57f   : > { %1109 = shalt.err (!%p1106_p6)
}
 0x580   : > { %s1110_s10 = scalar_lea.hbm %s719_s1, 256  ;;  %s1114_s8 = scalar_lea.hbm %s1612_s16, 1024 }
 0x581   : > { %p1111_p9 = scmp.ne.s32.totalorder %s719_s1, %s1110_s10  ;;  %p1115_p11 = scmp.lt.s32.totalorder %s719_s1, %s1612_s16 }
 0x582   : > { %p1116_p12 = scmp.lt.s32.totalorder %s1114_s8, %s1110_s10 }
 0x583   : > { %p1112_p8 = pnand %p1111_p9, %p1400_p0 }
 0x584   : > { %p1117_p13 = por %p1116_p12, %p1115_p11 }
 0x585   : > { %p1113_p10 = pneg %p1112_p8 }
 0x587   : > { %p1118_p5 = pnand %p1117_p13, %p1113_p10 }
 0x589   : > { %1121 = shalt.err (!%p1118_p5)
}
 0x58a   : > { %910 = dma.vmem_to_hbm [thread:$0]  (%p1400_p0), %s722_s24, 256, %s719_s1, %s702_s13  }
 0x58b PF: > { %p921_p1 = scmp.ge.s32.totalorder %s1232_s14, 2  ;;  %s733_s15 = sand.u32 1, %s1184_s26  }
 0x58c   : > { %s734_s20 = scalar_lea.sflag [#allocation9], %s733_s15 }
 0x58d   : > { %p917_p3 = pnand %p921_p1, %p1409_p2 }
 0x58f   : > { %p918_p7 = pneg %p917_p3 }
 0x591   : > { %1179 = dma.done.wait (%p918_p7), %s734_s20, 256  }
 0x592   : > { %1181 = vsyncadd (%p918_p7), %s734_s20, 4294967040  ;;  %s24_s14 = sadd.s32 1, %s1232_s14   ;;  %s1615_s12 = sld [smem:[#allocation13_spill]] }
 0x593   : > { %p1532_p4 = scmp.ge.s32.totalorder %s24_s14, 10   ;;  %s1616_s8 = sld [smem:[#allocation19_spill]] }
 0x594   : > { %s1617_s9 = sld [smem:[#allocation14_spill]]  ;;  %s1623_s26 = smov %s1188_s27 }
 0x595   : > { %s1618_s10 = sld [smem:[#allocation15_spill]]  ;;  %s1624_s27 = smov %s1192_s28 }
 0x596   : > { %s1619_s4 = sld [smem:[#allocation16_spill]]  ;;  %s1625_s28 = smov %s1407_s3 }
 0x597   : > { %s1620_s11 = sld [smem:[#allocation17_spill]]  ;;  %s1626_s29 = smov %s1200_s30 }
 0x598   : > { %s1621_s18 = sld [smem:[#allocation18_spill]]  ;;  %s1627_s30 = smov %s1615_s12 }
 0x599   : > { %s1622_s13 = sld [smem:[#allocation20_spill]] }
 0x59a   :  { %23 = sbr.rel (!%p1532_p4) target bundleno = 15 (0xf), region = 117 }
 0x59e   : > { %s1628_s12 = smov %s1621_s18 }
 0x59f   :  { %739 = vsyncpa [#allocation8], 1 }
 0x5a0   :  { %741 = vsyncpa [#allocation8 + $0x1], 1 }
 0x5a1   :  { %742 = vsyncpa [#allocation9], 1 }
 0x5a2   :  { %744 = vsyncpa [#allocation9 + $0x1], 1 }

</bundles_post_ra>
